<compile_context>
chip_gen: v5e
topology: v5e:2x2
jax: 0.10.0
libtpu: 0.0.40
codegen_flags: <defaults>
</compile_context>

<pallas_src>
import jax
import jax.numpy as jnp
from jax import lax
from jax.experimental import pallas as pl
from jax.experimental.pallas import tpu as pltpu

N_PAD = 128       # static lane width for the sentence axis (capacity)
FLAG_ROWS = 4     # packed flag rows (sublane axis)

# Packed input layout, int32 [FLAG_ROWS, N_PAD] (sublane x lane, lane = sentence):
#   row 0: sent_invalid      (nonzero if LLM output for sentence was invalid)
#   row 1: format_negative
#   row 2: span_negative
#   row 3: pred_eq_target    (nonzero if parsed prediction == gold spans)
# Scalar input, int32 [1] in SMEM: actual number of sentences n (<= N_PAD).
# Output layout, int32 [8] in SMEM:
#   [invalid_sents, format_negatives, span_negatives, negative,
#    false_positive, true_positive, num_sentences, 0]


def icl_stats_kernel(n_ref, flags_ref, out_ref):
    """Masked lane reductions of per-sentence ICL-NER outcome flags."""
    n = n_ref[0]                                            # runtime sentence count
    raw = flags_ref[...]                                    # (FLAG_ROWS, N_PAD) int32

    # Valid-sentence lane mask from the runtime count (never materialized in HBM).
    lane = lax.broadcasted_iota(jnp.int32, raw.shape, 1)
    valid = lane < n

    # Booleanize + mask every row: robust to non-{0,1} flags and to pad contents.
    f = jnp.logical_and(raw != 0, valid).astype(jnp.int32)  # (FLAG_ROWS, N_PAD)

    inv = f[0:1, :]                                         # sent_invalid
    fmt = f[1:2, :]                                         # format_negative
    spn = f[2:3, :]                                         # span_negative
    eq = f[3:4, :]                                          # pred == target

    sum_inv = jnp.sum(inv)
    sum_fmt = jnp.sum(fmt)
    sum_spn = jnp.sum(spn)
    sum_eq = jnp.sum(eq)
    fp = jnp.sum(eq * inv)                                  # pred==target AND invalid

    out_ref[0] = sum_inv                                    # invalid_sents
    out_ref[1] = sum_fmt                                    # format_negatives
    out_ref[2] = sum_spn                                    # span_negatives
    out_ref[3] = n - sum_eq                                 # negative (pred != target)
    out_ref[4] = fp                                         # false_positive
    out_ref[5] = sum_eq - fp                                # true_positive
    out_ref[6] = n                                          # num_sentences
    out_ref[7] = jnp.int32(0)                               # pad slot


def icl_zh_ner_forward_stats(sent_invalid, format_negative, span_negative,
                             pred_eq_target):
    """Pack per-sentence flags, run the Pallas reduction kernel, and return the
    same statistics dict keys as ICLZhNERModel.forward."""
    n = sent_invalid.shape[0]
    if n > N_PAD:
        raise ValueError(f"at most {N_PAD} sentences supported, got {n}")

    # Single fused pack: one stack + one lane pad to the static capacity.
    flags = jnp.stack(
        [
            sent_invalid.astype(jnp.int32),
            format_negative.astype(jnp.int32),
            span_negative.astype(jnp.int32),
            pred_eq_target.astype(jnp.int32),
        ],
        axis=0,
    )                                                       # (4, n)
    flags = jnp.pad(flags, ((0, 0), (0, N_PAD - n)))        # (4, N_PAD)
    n_arr = jnp.full((1,), n, dtype=jnp.int32)              # runtime scalar, SMEM

    out = pl.pallas_call(
        icl_stats_kernel,
        out_shape=jax.ShapeDtypeStruct((8,), jnp.int32),
        in_specs=[
            pl.BlockSpec(memory_space=pltpu.MemorySpace.SMEM),   # n
            pl.BlockSpec(memory_space=pltpu.MemorySpace.VMEM),   # flags tile
        ],
        out_specs=pl.BlockSpec(memory_space=pltpu.MemorySpace.SMEM),
    )(n_arr, flags)

    return {
        # TODO(synk): 'pred' / 'target' are Python lists of parsed entity
        # spans coming from the LLM text; no tensor equivalent.
        "pred": None,
        "target": None,
        "invalid_sent": out[0],
        "format_negative": out[1],
        "span_negative": out[2],
        "negative": out[3],
        "false_positive": out[4],
        "true_positive": out[5],
        "num_sentences": out[6],
    }


if __name__ == "__main__":
    # TODO(synk): prompt construction, random demonstration sampling,
    # completions_with_gpt_backoff (LLM API call), format_cn_entities text
    # parsing, and file writes have no Pallas equivalent; the per-sentence
    # outcome flags they would produce are synthesized deterministically here.
    key = jax.random.PRNGKey(0)
    n_sentences = 8  # small batch of sentences

    k1, k2, k3, k4 = jax.random.split(key, 4)
    sent_invalid = jax.random.bernoulli(k1, 0.3, (n_sentences,)).astype(jnp.int32)
    format_negative = jax.random.bernoulli(k2, 0.2, (n_sentences,)).astype(jnp.int32)
    span_negative = jax.random.bernoulli(k3, 0.2, (n_sentences,)).astype(jnp.int32)
    pred_eq_target = jax.random.bernoulli(k4, 0.6, (n_sentences,)).astype(jnp.int32)

    stats = icl_zh_ner_forward_stats(
        sent_invalid, format_negative, span_negative, pred_eq_target
    )
    stats = {k: (jax.block_until_ready(v) if v is not None else v)
             for k, v in stats.items()}

    # Same invariant the PyTorch module asserts:
    total = (int(stats["true_positive"]) + int(stats["false_positive"])
             + int(stats["negative"]))
    assert total == n_sentences, (total, n_sentences)
    assert int(stats["num_sentences"]) == n_sentences

    # Cross-check against a plain-JAX reference of the aggregation.
    eq = pred_eq_target.astype(jnp.int32)
    inv = sent_invalid.astype(jnp.int32)
    ref = {
        "invalid_sent": int(jnp.sum(inv)),
        "format_negative": int(jnp.sum(format_negative)),
        "span_negative": int(jnp.sum(span_negative)),
        "negative": int(jnp.sum(1 - eq)),
        "false_positive": int(jnp.sum(eq * inv)),
        "true_positive": int(jnp.sum(eq * (1 - inv))),
    }
    for k, v in ref.items():
        assert int(stats[k]) == v, (k, int(stats[k]), v)

    print("KERNEL_OK")
</pallas_src>

<mosaic_0001>
module attributes {stable_mosaic.version = 11 : i64} {
  func.func @icl_stats_kernel(%arg0: memref<1xi32, #tpu.memory_space<smem>>, %arg1: memref<4x128xi32, #tpu.memory_space<vmem>>, %arg2: memref<8xi32, #tpu.memory_space<smem>>) attributes {dimension_semantics = [], scalar_prefetch = 0 : i64, scratch_operands = 0 : i64, tpu.core_type = #tpu.core_type<tc>} {
    %c0 = arith.constant 0 : index
    %0 = memref.load %arg0[%c0] : memref<1xi32, #tpu.memory_space<smem>>
    %c0_0 = arith.constant 0 : index
    %c0_1 = arith.constant 0 : index
    %1 = vector.load %arg1[%c0_0, %c0_1] : memref<4x128xi32, #tpu.memory_space<vmem>>, vector<4x128xi32>
    %2 = tpu.iota {dimensions = array<i32: 1>} : vector<4x128xi32>
    %3 = vector.broadcast %0 : i32 to vector<4x128xi32>
    %4 = arith.cmpi slt, %2, %3 : vector<4x128xi32>
    %c0_i32 = arith.constant 0 : i32
    %5 = vector.broadcast %c0_i32 : i32 to vector<4x128xi32>
    %6 = arith.cmpi ne, %1, %5 : vector<4x128xi32>
    %7 = arith.andi %6, %4 : vector<4x128xi1>
    %8 = arith.extui %7 : vector<4x128xi1> to vector<4x128xi32>
    %9 = vector.extract_strided_slice %8 {offsets = [0, 0], sizes = [1, 128], strides = [1, 1]} : vector<4x128xi32> to vector<1x128xi32>
    %10 = vector.extract_strided_slice %8 {offsets = [1, 0], sizes = [1, 128], strides = [1, 1]} : vector<4x128xi32> to vector<1x128xi32>
    %11 = vector.extract_strided_slice %8 {offsets = [2, 0], sizes = [1, 128], strides = [1, 1]} : vector<4x128xi32> to vector<1x128xi32>
    %12 = vector.extract_strided_slice %8 {offsets = [3, 0], sizes = [1, 128], strides = [1, 1]} : vector<4x128xi32> to vector<1x128xi32>
    %13 = vector.shape_cast %9 : vector<1x128xi32> to vector<1x1x128xi32>
    %cst = arith.constant dense<0> : vector<1xi32>
    %14 = vector.multi_reduction <add>, %13, %cst [1, 2] : vector<1x1x128xi32> to vector<1xi32>
    %15 = vector.shape_cast %14 : vector<1xi32> to vector<1x1x1xi32>
    %16 = vector.extract %15[0, 0, 0] : i32 from vector<1x1x1xi32>
    %17 = vector.shape_cast %10 : vector<1x128xi32> to vector<1x1x128xi32>
    %cst_2 = arith.constant dense<0> : vector<1xi32>
    %18 = vector.multi_reduction <add>, %17, %cst_2 [1, 2] : vector<1x1x128xi32> to vector<1xi32>
    %19 = vector.shape_cast %18 : vector<1xi32> to vector<1x1x1xi32>
    %20 = vector.extract %19[0, 0, 0] : i32 from vector<1x1x1xi32>
    %21 = vector.shape_cast %11 : vector<1x128xi32> to vector<1x1x128xi32>
    %cst_3 = arith.constant dense<0> : vector<1xi32>
    %22 = vector.multi_reduction <add>, %21, %cst_3 [1, 2] : vector<1x1x128xi32> to vector<1xi32>
    %23 = vector.shape_cast %22 : vector<1xi32> to vector<1x1x1xi32>
    %24 = vector.extract %23[0, 0, 0] : i32 from vector<1x1x1xi32>
    %25 = vector.shape_cast %12 : vector<1x128xi32> to vector<1x1x128xi32>
    %cst_4 = arith.constant dense<0> : vector<1xi32>
    %26 = vector.multi_reduction <add>, %25, %cst_4 [1, 2] : vector<1x1x128xi32> to vector<1xi32>
    %27 = vector.shape_cast %26 : vector<1xi32> to vector<1x1x1xi32>
    %28 = vector.extract %27[0, 0, 0] : i32 from vector<1x1x1xi32>
    %29 = arith.muli %12, %9 : vector<1x128xi32>
    %30 = vector.shape_cast %29 : vector<1x128xi32> to vector<1x1x128xi32>
    %cst_5 = arith.constant dense<0> : vector<1xi32>
    %31 = vector.multi_reduction <add>, %30, %cst_5 [1, 2] : vector<1x1x128xi32> to vector<1xi32>
    %32 = vector.shape_cast %31 : vector<1xi32> to vector<1x1x1xi32>
    %33 = vector.extract %32[0, 0, 0] : i32 from vector<1x1x1xi32>
    %c0_6 = arith.constant 0 : index
    %34 = memref.load %arg2[%c0_6] : memref<8xi32, #tpu.memory_space<smem>>
    memref.store %16, %arg2[%c0_6] : memref<8xi32, #tpu.memory_space<smem>>
    %c1 = arith.constant 1 : index
    %35 = memref.load %arg2[%c1] : memref<8xi32, #tpu.memory_space<smem>>
    memref.store %20, %arg2[%c1] : memref<8xi32, #tpu.memory_space<smem>>
    %c2 = arith.constant 2 : index
    %36 = memref.load %arg2[%c2] : memref<8xi32, #tpu.memory_space<smem>>
    memref.store %24, %arg2[%c2] : memref<8xi32, #tpu.memory_space<smem>>
    %37 = arith.subi %0, %28 : i32
    %c3 = arith.constant 3 : index
    %38 = memref.load %arg2[%c3] : memref<8xi32, #tpu.memory_space<smem>>
    memref.store %37, %arg2[%c3] : memref<8xi32, #tpu.memory_space<smem>>
    %c4 = arith.constant 4 : index
    %39 = memref.load %arg2[%c4] : memref<8xi32, #tpu.memory_space<smem>>
    memref.store %33, %arg2[%c4] : memref<8xi32, #tpu.memory_space<smem>>
    %40 = arith.subi %28, %33 : i32
    %c5 = arith.constant 5 : index
    %41 = memref.load %arg2[%c5] : memref<8xi32, #tpu.memory_space<smem>>
    memref.store %40, %arg2[%c5] : memref<8xi32, #tpu.memory_space<smem>>
    %c6 = arith.constant 6 : index
    %42 = memref.load %arg2[%c6] : memref<8xi32, #tpu.memory_space<smem>>
    memref.store %0, %arg2[%c6] : memref<8xi32, #tpu.memory_space<smem>>
    %c0_i32_7 = arith.constant 0 : i32
    %c7 = arith.constant 7 : index
    %43 = memref.load %arg2[%c7] : memref<8xi32, #tpu.memory_space<smem>>
    memref.store %c0_i32_7, %arg2[%c7] : memref<8xi32, #tpu.memory_space<smem>>
    return
  }
}

</mosaic_0001>

<bundles_post_ra>
// kernel: tpu_custom_call.1
= control target key start
LH: loop header
LB: loop body
LE: loop exit
PB: predicated region body
PF: predicated region fallthrough
CT: control target
= control target key end

     0   :  { %8 = vsyncpa [#allocation4], 0  ;;  %s266_s0 = inlined_call_operand.<no memory space> [shape: s32[1], index: 0, kind: input, shape index: {}]   ;;  %s267_s1 = inlined_call_operand.hbm [shape: s32[4,128], index: 1, kind: input, shape index: {}]   ;;  %s268_s2 = inlined_call_operand.hbm [shape: s32[8], index: 2, kind: output, shape index: {}]  }
   0x1   :  { %9 = vsyncpa [#allocation5], 0  ;;  %s17_s11 = sshll.u32 %s267_s1, 4  ;;  %s230_s12 = smov [#allocation3]   ;;  %s18_s11 = int_to_ptr.hbm [resolvable:$true] %s17_s11 }
   0x2   :  { %s19_s13 = sshll.u32 %s230_s12, 4  ;;  %s20_s13 = int_to_ptr.vmem [resolvable:$true] %s19_s13 }
   0x3   :  { %22 = dma.hbm_to_vmem [thread:$0]  %s18_s11, 64, %s20_s13, [#allocation4]  }
   0x4   :  { %226 = dma.done.wait [#allocation4], 64  }
   0x5   :  { %227 = vsyncadd [#allocation4], 4294967232  ;;  %v29_v0 = vlaneseq  ;;  %157 = sst [smem:[#allocation6 + $0x6]] %s266_s0  ;;  %s231_s16 = smov 0   ;;  %v31_v2 = vstv %s266_s0  ;;  %v28_v3 = vld [vmem:[#allocation3] sm:$0xf] }
   0x6   :  { %159 = sst [smem:[#allocation6 + $0x7]] %s231_s16  ;;  %vm33_vm1 = vcmp.ne.s32.totalorder %v28_v3, 0  ;;  %vm78_vm2 = vcmask 1042434   ;;  %vm36_vm3 = vcmask 1040384   ;;  %v232_v4 = vmov 0   ;;  %s165_s27 = sshll.u32 %s268_s2, 4  ;;  %s166_s27 = int_to_ptr.hbm [resolvable:$true] %s165_s27 }
   0x7   :  { %v30_v1 = vand.u32 127, %v29_v0  ;;  %vm99_vm5 = vcmask 1043459   ;;  %vm57_vm6 = vcmask 1041409   ;;  %s233_s30 = smov [#allocation6]  }
   0x9   :  { %vm32_vm0 = vcmp.lt.s32.totalorder %v30_v1, %v31_v2 }
   0xa   :  { %vm34_vm4 = vmand %vm33_vm1, %vm32_vm0 }
   0xb   :  { %v35_v5 = vsel %vm34_vm4, 1, %v232_v4 }
   0xc   :  { %v79_v6 = vsel %vm78_vm2, %v35_v5, 0  ;;  %v37_v7 = vsel %vm36_vm3, %v35_v5, 0  ;;  %v100_v11 = vsel %vm99_vm5, %v35_v5, 0  ;;  %v58_v12 = vsel %vm57_vm6, %v35_v5, 0 }
   0xd   :  { %v81_v8 = vshrl.u32 %v79_v6, 16  ;;  %v39_v9 = vshrl.u32 %v37_v7, 16  ;;  %v38_v10 = vand.u32 65535, %v37_v7  ;;  %v120_v13 = vrot.slane %v35_v5, 5 }
   0xe   :  { %v102_v18 = vshrl.u32 %v100_v11, 16  ;;  %v60_v19 = vshrl.u32 %v58_v12, 16  ;;  %v80_v25 = vand.u32 65535, %v79_v6  ;;  %v59_v26 = vand.u32 65535, %v58_v12 }
   0xf   :  { %v83_v14 = vcvt.s32.f32 %v81_v8  ;;  %v41_v15 = vcvt.s32.f32 %v39_v9  ;;  %v40_v16 = vcvt.s32.f32 %v38_v10  ;;  %v121_v17 = vmul.u32 %v120_v13, %v35_v5 }
  0x10   :  { %v104_v22 = vcvt.s32.f32 %v102_v18  ;;  %v62_v23 = vcvt.s32.f32 %v60_v19  ;;  %v101_v27 = vand.u32 65535, %v100_v11  ;;  %v82_v28 = vcvt.s32.f32 %v80_v25 }
  0x11   :  { %86 = vadd.xlane.f32.xlu1 %v83_v14  ;;  %44 = vadd.xlane.f32.xlu0 %v41_v15  ;;  %v122_v20 = vsel %vm99_vm5, %v121_v17, 0  ;;  %v61_v29 = vcvt.s32.f32 %v59_v26 }
  0x12   :  { %42 = vadd.xlane.f32.xlu2 %v40_v16  ;;  %v124_v21 = vshrl.u32 %v122_v20, 16  ;;  %v103_v30 = vcvt.s32.f32 %v101_v27  ;;  %v123_v31 = vand.u32 65535, %v122_v20 }
  0x14   :  { %v126_v24 = vcvt.s32.f32 %v124_v21  ;;  %v125_v32 = vcvt.s32.f32 %v123_v31 }
  0x19   :  { %107 = vadd.xlane.f32.xlu1 %v104_v22  ;;  %65 = vadd.xlane.f32.xlu0 %v62_v23 }
  0x1a   :  { %129 = vadd.xlane.f32.xlu2 %v126_v24 }
  0x21   :  { %84 = vadd.xlane.f32.xlu1 %v82_v28  ;;  %63 = vadd.xlane.f32.xlu0 %v61_v29 }
  0x22   :  { %105 = vadd.xlane.f32.xlu2 %v103_v30 }
  0x29   :  { %127 = vadd.xlane.f32.xlu0 %v125_v32 }
  0x84   :  { %v87_v33 = vpop.xlane.xlu1 %86  ;;  %v45_v34 = vpop.xlane.xlu0 %44 }
  0x85   :  { %v47_v35 = vcvt.f32.s32 %v45_v34  ;;  %v43_v36 = vpop.xlane.xlu2 %42  ;;  %v89_v46 = vcvt.f32.s32 %v87_v33 }
  0x86   :  { %v46_v37 = vcvt.f32.s32 %v43_v36 }
  0x87   :  { %v48_v38 = vshll.u32 %v47_v35, 16  ;;  %v90_v51 = vshll.u32 %v89_v46, 16 }
  0x89   :  { %v49_v39 = vadd.s32 %v48_v38, %v46_v37 }
  0x8b   :  { %v50_v40 = vrot.slane %v49_v39, 4 }
  0x8c   :  { %v108_v41 = vpop.xlane.xlu1 %107  ;;  %v66_v42 = vpop.xlane.xlu0 %65 }
  0x8d   :  { %v130_v43 = vpop.xlane.xlu2 %129  ;;  %v51_v44 = vadd.s32 %v50_v40, %v49_v39  ;;  %v110_v47 = vcvt.f32.s32 %v108_v41  ;;  %v68_v48 = vcvt.f32.s32 %v66_v42 }
  0x8e   :  { %v132_v0 = vcvt.f32.s32 %v130_v43 }
  0x8f   :  { %v52_v45 = vrot.slane %v51_v44, 2  ;;  %v111_v52 = vshll.u32 %v110_v47, 16  ;;  %v69_v55 = vshll.u32 %v68_v48, 16 }
  0x90   :  { %v133_v8 = vshll.u32 %v132_v0, 16 }
  0x91   :  { %v53_v49 = vadd.s32 %v52_v45, %v51_v44 }
  0x93   :  { %v54_v50 = vrot.slane %v53_v49, 1 }
  0x94   :  { %v85_v53 = vpop.xlane.xlu1 %84  ;;  %v64_v54 = vpop.xlane.xlu0 %63 }
  0x95   :  { %v88_v56 = vcvt.f32.s32 %v85_v53  ;;  %v67_v57 = vcvt.f32.s32 %v64_v54  ;;  %v106_v58 = vpop.xlane.xlu2 %105  ;;  %v55_v59 = vadd.s32 %v54_v50, %v53_v49 }
  0x96   :  { %v109_v60 = vcvt.f32.s32 %v106_v58 }
  0x97   :  { %v91_v61 = vadd.s32 %v90_v51, %v88_v56  ;;  %v70_v62 = vadd.s32 %v69_v55, %v67_v57  ;;  %176 = vpush %v55_v59 }
  0x98   :  { %v112_v63 = vadd.s32 %v111_v52, %v109_v60 }
  0x99   :  { %v92_v1 = vrot.slane %v91_v61, 4  ;;  %v71_v2 = vrot.slane %v70_v62, 4 }
  0x9a   :  { %v113_v3 = vrot.slane %v112_v63, 4 }
  0x9b   :  { %v93_v4 = vadd.s32 %v92_v1, %v91_v61  ;;  %v72_v5 = vadd.s32 %v71_v2, %v70_v62 }
  0x9c   :  { %v114_v6 = vadd.s32 %v113_v3, %v112_v63  ;;  %v128_v7 = vpop.xlane.xlu0 %127 }
  0x9d   :  { %v131_v9 = vcvt.f32.s32 %v128_v7  ;;  %v73_v10 = vrot.slane %v72_v5, 2  ;;  %v94_v11 = vrot.slane %v93_v4, 2 }
  0x9e   :  { %v115_v12 = vrot.slane %v114_v6, 2 }
  0x9f   :  { %v134_v13 = vadd.s32 %v133_v8, %v131_v9  ;;  %v74_v14 = vadd.s32 %v73_v10, %v72_v5  ;;  %v95_v15 = vadd.s32 %v94_v11, %v93_v4 }
  0xa0   :  { %v116_v16 = vadd.s32 %v115_v12, %v114_v6 }
  0xa1   :  { %v135_v17 = vrot.slane %v134_v13, 4  ;;  %v75_v18 = vrot.slane %v74_v14, 1  ;;  %v96_v19 = vrot.slane %v95_v15, 1 }
  0xa2   :  { %v117_v20 = vrot.slane %v116_v16, 1 }
  0xa3   :  { %v136_v21 = vadd.s32 %v135_v17, %v134_v13  ;;  %v76_v22 = vadd.s32 %v75_v18, %v74_v14  ;;  %v97_v23 = vadd.s32 %v96_v19, %v95_v15 }
  0xa4   :  { %v118_v24 = vadd.s32 %v117_v20, %v116_v16 }
  0xa5   :  { %178 = vpush %v76_v22  ;;  %v137_v25 = vrot.slane %v136_v21, 2 }
  0xa6   :  { %180 = vpush %v97_v23 }
  0xa7   :  { %182 = vpush %v118_v24  ;;  %v138_v26 = vadd.s32 %v137_v25, %v136_v21 }
  0xa9   :  { %v139_v27 = vrot.slane %v138_v26, 1 }
  0xab   :  { %v140_v28 = vadd.s32 %v139_v27, %v138_v26 }
  0xad   :  { %184 = vpush %v140_v28 }
  0xc8   :  { %s177_s1 = spop %176 }
  0xc9   :  { %143 = sst [smem:[#allocation6]] %s177_s1 }
  0xd6   :  { %s179_s19 = spop %178 }
  0xd7   :  { %145 = sst [smem:[#allocation6 + $0x1]] %s179_s19  ;;  %s181_s20 = spop %180 }
  0xd8   :  { %147 = sst [smem:[#allocation6 + $0x2]] %s181_s20  ;;  %s183_s21 = spop %182 }
  0xd9   :  { %s148_s24 = ssub.s32 %s266_s0, %s183_s21 }
  0xda   :  { %150 = sst [smem:[#allocation6 + $0x3]] %s148_s24 }
  0xde   :  { %s185_s28 = spop %184 }
  0xdf   :  { %152 = sst [smem:[#allocation6 + $0x4]] %s185_s28  ;;  %s153_s29 = ssub.s32 %s183_s21, %s185_s28 }
  0xe0   :  { %155 = sst [smem:[#allocation6 + $0x5]] %s153_s29 }
  0xe1   :  { %168 = dma.smem_to_hbm %s233_s30, 16, %s166_s27, [#allocation5]  }
  0xe2   :  { %228 = dma.done.wait [#allocation5], 16  }
  0xe3   :  { %229 = vsyncadd [#allocation5], 4294967280 }
  0xe4   :  { %173 = sfence }
  0xe5   :  { %174 = vsyncpa [#allocation4], 1 }
  0xe6   :  { %175 = vsyncpa [#allocation5], 1 }

</bundles_post_ra>
